<compile_context>
chip_gen: v5e
topology: v5e:2x2
jax: 0.10.0
libtpu: 0.0.40
codegen_flags: <defaults>
</compile_context>

<pallas_src>
import jax
import jax.numpy as jnp
from jax.experimental import pallas as pl
from jax.experimental.pallas import tpu as pltpu


_SCRATCH_REG_THRESHOLD = 128 * 1024  # bytes; below this, keep activations in vregs


def _round_up(x: int, m: int) -> int:
    return ((x + m - 1) // m) * m


def _apply_act(x, name):
    if name == "relu":
        return jnp.maximum(x, 0.0)
    if name == "leaky-relu":
        return jnp.where(x >= 0.0, x, 0.01 * x)  # PyTorch default slope
    return x  # ' ' -> NonlinRem (identity)


def _vmem_budget_bytes() -> int:
    """Per-core VMEM budget with ~12.5% headroom for Mosaic internal scratch."""
    cap = 64 << 20  # conservative fallback (v7x per-TC VMEM)
    try:
        cap = int(pltpu.get_tpu_info().vmem_capacity_bytes)
    except Exception:
        pass
    return int(cap * 7 // 8)


def _allow_256_pad() -> bool:
    """256x256 MXU generations (v6e/v7x) benefit from 256-lane alignment."""
    try:
        kind = jax.devices()[0].device_kind.lower()
    except Exception:
        return True
    return not any(g in kind for g in ("v2", "v3", "v4", "v5"))


def _pad_dim(d: int, allow_256: bool) -> int:
    p128 = _round_up(d, 128)
    if allow_256:
        p256 = _round_up(d, 256)
        if p256 - d <= max(d // 8, 32):  # only when the extra padding is cheap
            return p256
    return p128


# ----------------------------------------------------------------------------
# Fused resident-weight path: one pallas_call, batch-tiled grid, weights stay
# in VMEM across all grid steps.
# ----------------------------------------------------------------------------
def _make_fused_kernel(num_layers, nonlinearity, dims_pad, compute_dtype, use_scratch):
    cd = jnp.dtype(compute_dtype)

    def kernel(*refs):
        # refs = (x_ref, w0, b0, ..., w_{L-1}, b_{L-1}, out_ref[, h_scratch])
        x_ref = refs[0]
        out_ref = refs[1 + 2 * num_layers]
        h_ref = refs[2 + 2 * num_layers] if use_scratch else None

        h = x_ref[...]
        if h.dtype != cd:
            h = h.astype(cd)
        for layer in range(num_layers):
            w_ref = refs[1 + 2 * layer]
            b_ref = refs[2 + 2 * layer]
            acc = jnp.dot(h, w_ref[...], preferred_element_type=jnp.float32)
            acc = acc + b_ref[...]  # (1, out_pad) f32 bias broadcast
            if layer == num_layers - 1:
                out_ref[...] = acc.astype(out_ref.dtype)
            else:
                a = _apply_act(acc, nonlinearity).astype(cd)
                if use_scratch:
                    od = dims_pad[layer + 1]
                    # Bound vreg live ranges for large tiles / hidden widths.
                    h_ref[:, :od] = a
                    h = h_ref[:, :od]
                else:
                    h = a  # small: stay in registers, no VMEM round trip

    return kernel


def _mlp_forward_fused(x, params, nonlinearity, dims, dims_pad, tile_b,
                       compute_dtype, use_pipeline_hints):
    num_layers = len(params)
    batch, in_dim = x.shape
    out_dim = dims[-1]
    in_pad, out_pad = dims_pad[0], dims_pad[-1]
    inter_pads = dims_pad[1:-1]
    max_inter = max(inter_pads) if inter_pads else 0
    cd = jnp.dtype(compute_dtype)
    out_dtype = x.dtype

    b_pad = _round_up(batch, tile_b)
    grid_steps = b_pad // tile_b
    use_scratch = tile_b * max_inter * cd.itemsize > _SCRATCH_REG_THRESHOLD

    wb_bytes = sum(dims_pad[l] * dims_pad[l + 1] * cd.itemsize + dims_pad[l + 1] * 4
                   for l in range(num_layers))
    # Deep-buffer the x tile only when compute per step is small (DMA exposed)
    # and there are enough steps for the extra buffers to matter.
    deep_io = grid_steps >= 3 and wb_bytes <= (8 << 20)

    def spec(shape, index_map, bufs=None):
        if use_pipeline_hints and bufs is not None:
            return pl.BlockSpec(shape, index_map, pipeline_mode=pl.Buffered(bufs))
        return pl.BlockSpec(shape, index_map)

    # --- host-side input pad / cast (skipped when already aligned) ----------
    if b_pad == batch and in_pad == in_dim:
        xp = x if x.dtype == cd else x.astype(cd)
    else:
        xp = jnp.zeros((b_pad, in_pad), cd).at[:batch, :in_dim].set(x.astype(cd))

    flat_args = [xp]
    in_specs = [spec((tile_b, in_pad), lambda i: (i, 0), 3 if deep_io else None)]
    for layer, (w, b) in enumerate(params):
        ip, op = dims_pad[layer], dims_pad[layer + 1]
        if w.shape == (ip, op) and w.dtype == cd:
            wp = w
        else:
            wp = jnp.zeros((ip, op), cd).at[:w.shape[0], :w.shape[1]].set(w.astype(cd))
        b2 = b.reshape(1, -1).astype(jnp.float32)
        bp = b2 if b2.shape[-1] == op else jnp.zeros((1, op), jnp.float32).at[:, :b2.shape[-1]].set(b2)
        flat_args += [wp, bp]
        # Constant index_map -> fetched once, VMEM-resident; single-buffered.
        in_specs += [spec((ip, op), lambda i: (0, 0), 1),
                     spec((1, op), lambda i: (0, 0), 1)]

    out_specs = pl.BlockSpec((tile_b, out_pad), lambda i: (i, 0))
    scratch_shapes = [pltpu.VMEM((tile_b, max_inter), cd)] if use_scratch else []

    # --- VMEM budget ---------------------------------------------------------
    budget = _vmem_budget_bytes()
    x_bufs = 3 if deep_io else 2
    need = (wb_bytes * (1 if use_pipeline_hints else 2)
            + x_bufs * tile_b * in_pad * cd.itemsize
            + 2 * tile_b * out_pad * jnp.dtype(out_dtype).itemsize
            + (tile_b * max_inter * cd.itemsize if use_scratch else 0))
    vmem_limit = int(min(budget, max(int(need * 1.3) + (2 << 20), 16 << 20)))

    flops = 2 * b_pad * sum(dims_pad[i] * dims_pad[i + 1] for i in range(num_layers))
    bytes_accessed = (b_pad * in_pad * cd.itemsize
                      + b_pad * out_pad * jnp.dtype(out_dtype).itemsize
                      + wb_bytes)

    kernel = _make_fused_kernel(num_layers, nonlinearity, dims_pad, cd, use_scratch)

    out = pl.pallas_call(
        kernel,
        out_shape=jax.ShapeDtypeStruct((b_pad, out_pad), out_dtype),
        grid=(grid_steps,),
        in_specs=in_specs,
        out_specs=out_specs,
        scratch_shapes=scratch_shapes,
        compiler_params=pltpu.CompilerParams(
            dimension_semantics=("parallel",),
            vmem_limit_bytes=vmem_limit,
        ),
        cost_estimate=pl.CostEstimate(
            flops=flops, bytes_accessed=bytes_accessed, transcendentals=0),
    )(*flat_args)

    if b_pad == batch and out_pad == out_dim:
        return out
    return out[:batch, :out_dim]


# ----------------------------------------------------------------------------
# Streaming fallback: per-layer K/N-tiled matmul (+bias +act) when resident
# weights would not fit the per-core VMEM budget (e.g. large MLPs on v7x).
# ----------------------------------------------------------------------------
def _linear_streamed(x, w, b, act_name, *, compute_dtype, out_dtype,
                     tm=256, tn=256, tk=512):
    M, K = x.shape
    N = w.shape[1]
    cd = jnp.dtype(compute_dtype)

    tm = max(8, min(tm, _round_up(M, 8)))
    tn = max(128, min(tn, _round_up(N, 128)))
    tk = max(128, min(tk, _round_up(K, 128)))
    Mp, Kp, Np = _round_up(M, tm), _round_up(K, tk), _round_up(N, tn)

    xp = x.astype(cd) if (Mp == M and Kp == K) else \
        jnp.zeros((Mp, Kp), cd).at[:M, :K].set(x.astype(cd))
    wp = w.astype(cd) if (Kp == K and Np == N) else \
        jnp.zeros((Kp, Np), cd).at[:K, :N].set(w.astype(cd))
    b2 = b.reshape(1, -1).astype(jnp.float32)
    bp = b2 if Np == N else jnp.zeros((1, Np), jnp.float32).at[:, :N].set(b2)

    def kernel(x_ref, w_ref, b_ref, o_ref, acc_ref):
        @pl.when(pl.program_id(2) == 0)
        def _():
            acc_ref[...] = jnp.zeros_like(acc_ref)

        acc_ref[...] += jnp.dot(x_ref[...], w_ref[...],
                                preferred_element_type=jnp.float32)

        @pl.when(pl.program_id(2) == pl.num_programs(2) - 1)
        def _():
            o_ref[...] = _apply_act(acc_ref[...] + b_ref[...],
                                    act_name).astype(o_ref.dtype)

    out = pl.pallas_call(
        kernel,
        out_shape=jax.ShapeDtypeStruct((Mp, Np), out_dtype),
        grid=(Mp // tm, Np // tn, Kp // tk),
        in_specs=[pl.BlockSpec((tm, tk), lambda i, j, k: (i, k)),
                  pl.BlockSpec((tk, tn), lambda i, j, k: (k, j)),
                  pl.BlockSpec((1, tn), lambda i, j, k: (0, j))],
        out_specs=pl.BlockSpec((tm, tn), lambda i, j, k: (i, j)),
        scratch_shapes=[pltpu.VMEM((tm, tn), jnp.float32)],
        compiler_params=pltpu.CompilerParams(
            dimension_semantics=("parallel", "parallel", "arbitrary"),
            vmem_limit_bytes=_vmem_budget_bytes(),
        ),
        cost_estimate=pl.CostEstimate(
            flops=2 * Mp * Np * Kp,
            bytes_accessed=(Mp * Kp + Kp * Np) * cd.itemsize
                           + Mp * Np * jnp.dtype(out_dtype).itemsize,
            transcendentals=0),
    )(xp, wp, bp)

    if Mp == M and Np == N:
        return out
    return out[:M, :N]


# ----------------------------------------------------------------------------
# Public entry point.
# ----------------------------------------------------------------------------
def mlp_forward(x, params, nonlinearity="relu", *, tile_b=None,
                compute_dtype=jnp.bfloat16, force_streaming=False):
    """Runs the MLP forward pass with Pallas TPU kernels.

    Args:
      x: [B, inputsize] input (float32 typical).
      params: list of (W [in, out], b [1, out]) float32 tuples per linear layer.
      nonlinearity: 'relu', 'leaky-relu', or ' ' (identity) between layers
        (NOT after the final layer), matching the PyTorch module.
      tile_b: optional batch-tile override; otherwise the largest tile in
        {512,...,8} that fits the per-generation VMEM budget is used.
      compute_dtype: MXU dtype for weights / inter-layer activations.
        bfloat16 (default) is the production fast path on v5e/v6e/v7x;
        pass jnp.float32 for validation-grade numerics. Accumulation is
        always float32.
      force_streaming: force the tiled streaming-weight fallback path.
    """
    num_layers = len(params)
    batch, in_dim = x.shape
    dims = [in_dim] + [w.shape[1] for w, _ in params]
    allow256 = _allow_256_pad()
    dims_pad = [_pad_dim(d, allow256) for d in dims]
    cd = jnp.dtype(compute_dtype)

    in_pad, out_pad = dims_pad[0], dims_pad[-1]
    inter_pads = dims_pad[1:-1]
    max_inter = max(inter_pads) if inter_pads else 0
    out_itemsize = jnp.dtype(x.dtype).itemsize
    wb_bytes = sum(dims_pad[l] * dims_pad[l + 1] * cd.itemsize + dims_pad[l + 1] * 4
                   for l in range(num_layers))
    budget = _vmem_budget_bytes()

    # Pick the largest batch tile whose working set fits the VMEM budget.
    b_cap = _round_up(batch, 8)
    candidates = []
    if tile_b is not None:
        candidates.append(max(8, _round_up(int(tile_b), 8)))
    candidates += [512, 256, 128, 64, 32, 16, 8]
    chosen = None
    for t in candidates:
        t = min(t, b_cap)
        scratch_b = t * max_inter * cd.itemsize
        use_scratch = scratch_b > _SCRATCH_REG_THRESHOLD
        need = (wb_bytes
                + 3 * t * in_pad * cd.itemsize
                + 2 * t * out_pad * out_itemsize
                + (scratch_b if use_scratch else 0))
        if int(need * 1.15) + (2 << 20) <= budget:
            chosen = t
            break

    if not force_streaming and chosen is not None:
        try:
            return _mlp_forward_fused(x, params, nonlinearity, dims, dims_pad,
                                      chosen, compute_dtype, True)
        except Exception:
            # Retry without pipeline-depth hints (pl.Buffered) for robustness.
            return _mlp_forward_fused(x, params, nonlinearity, dims, dims_pad,
                                      chosen, compute_dtype, False)

    # Fallback: resident weights do not fit VMEM -> stream weight tiles per layer.
    h = x
    for i, (w, b) in enumerate(params):
        last = i == num_layers - 1
        h = _linear_streamed(h, w, b, " " if last else nonlinearity,
                             compute_dtype=compute_dtype,
                             out_dtype=x.dtype if last else compute_dtype)
    return h


# ----------------------------------------------------------------------------
# Reference / init helpers and self-test.
# ----------------------------------------------------------------------------
def init_mlp_params(key, inputsize, hidden_units, outputdim):
    """Deterministic init mimicking nn.Linear's default U(-1/sqrt(in), 1/sqrt(in))."""
    dims = [inputsize] + list(hidden_units) + [outputdim]
    params = []
    for i in range(len(dims) - 1):
        in_dim, out_dim = dims[i], dims[i + 1]
        key, kw, kb = jax.random.split(key, 3)
        bound = 1.0 / (in_dim ** 0.5)
        w = jax.random.uniform(kw, (in_dim, out_dim), jnp.float32,
                               minval=-bound, maxval=bound)
        b = jax.random.uniform(kb, (1, out_dim), jnp.float32,
                               minval=-bound, maxval=bound)
        params.append((w, b))
    return params


def mlp_reference(x, params, nonlinearity="relu"):
    """Pure-JAX reference for sanity checking (eval-mode dropout = identity)."""
    h = x
    for i, (w, b) in enumerate(params):
        h = h @ w + b.reshape(1, -1)
        if i != len(params) - 1:
            h = _apply_act(h, nonlinearity)
    return h


if __name__ == "__main__":
    # MLP(inputsize=32, outputdim=16, hidden_units=[64, 48],
    #     nonlinearity='relu', dropout_prob=0.1) in eval mode.
    batch, inputsize, hidden_units, outputdim = 8, 32, [64, 48], 16

    key = jax.random.PRNGKey(0)
    key, kx = jax.random.split(key)
    x = jax.random.normal(kx, (batch, inputsize), jnp.float32)
    params = init_mlp_params(key, inputsize, hidden_units, outputdim)
    ref = mlp_reference(x, params, "relu")

    # f32 validation path (fused, weights VMEM-resident).
    out_f32 = jax.block_until_ready(
        mlp_forward(x, params, "relu", compute_dtype=jnp.float32))
    assert out_f32.shape == (batch, outputdim)
    assert jnp.allclose(out_f32, ref, atol=2e-2, rtol=2e-2), "f32 mismatch"

    # bf16 production path (f32 accumulation on MXU).
    out_bf16 = jax.block_until_ready(
        mlp_forward(x, params, "relu", compute_dtype=jnp.bfloat16))
    assert out_bf16.shape == (batch, outputdim)
    assert jnp.allclose(out_bf16, ref, atol=5e-2, rtol=5e-2), "bf16 mismatch"

    # leaky-relu nonlinearity.
    out_lr = jax.block_until_ready(
        mlp_forward(x, params, "leaky-relu", compute_dtype=jnp.float32))
    ref_lr = mlp_reference(x, params, "leaky-relu")
    assert jnp.allclose(out_lr, ref_lr, atol=2e-2, rtol=2e-2), "leaky-relu mismatch"

    # Degenerate config: no hidden layers (input -> output), identity nonlin.
    params1 = init_mlp_params(jax.random.PRNGKey(1), inputsize, [], outputdim)
    out1 = jax.block_until_ready(
        mlp_forward(x, params1, " ", compute_dtype=jnp.float32))
    ref1 = mlp_reference(x, params1, " ")
    assert jnp.allclose(out1, ref1, atol=2e-2, rtol=2e-2), "1-layer mismatch"

    # Streaming-weight fallback path (forced; exercises the K/N-tiled kernel).
    out_s = jax.block_until_ready(
        mlp_forward(x, params, "relu", compute_dtype=jnp.float32,
                    force_streaming=True))
    assert jnp.allclose(out_s, ref, atol=2e-2, rtol=2e-2), "streaming mismatch"

    # Aligned multi-step grid: exercises skip-pad, Buffered(3) x-pipeline and
    # Buffered(1) resident weights across 4 grid steps.
    b2, in2, hid2, out2 = 512, 128, [256], 128
    k2 = jax.random.PRNGKey(2)
    k2, kx2 = jax.random.split(k2)
    x2 = jax.random.normal(kx2, (b2, in2), jnp.float32)
    params2 = init_mlp_params(k2, in2, hid2, out2)
    out_big = jax.block_until_ready(
        mlp_forward(x2, params2, "relu", tile_b=128, compute_dtype=jnp.float32))
    ref_big = mlp_reference(x2, params2, "relu")
    assert jnp.allclose(out_big, ref_big, atol=2e-2, rtol=2e-2), "aligned mismatch"

    print("KERNEL_OK")
</pallas_src>

<mosaic_0001>
module attributes {stable_mosaic.version = 11 : i64} {
  func.func @kernel(%arg0: i32, %arg1: memref<8x128xf32, #tpu.memory_space<vmem>>, %arg2: memref<128x128xf32, #tpu.memory_space<vmem>>, %arg3: memref<1x128xf32, #tpu.memory_space<vmem>>, %arg4: memref<128x128xf32, #tpu.memory_space<vmem>>, %arg5: memref<1x128xf32, #tpu.memory_space<vmem>>, %arg6: memref<128x128xf32, #tpu.memory_space<vmem>>, %arg7: memref<1x128xf32, #tpu.memory_space<vmem>>, %arg8: memref<8x128xf32, #tpu.memory_space<vmem>>) attributes {dimension_semantics = [#tpu.dimension_semantics<parallel>], iteration_bounds = array<i64: 1>, scalar_prefetch = 0 : i64, scratch_operands = 0 : i64, tpu.core_type = #tpu.core_type<tc>, window_params = [{transform_indices = @transform_0, window_bounds = array<i64: 8, 128>}, {pipeline_mode = #tpu.pipeline_mode<synchronous>, transform_indices = @transform_1, window_bounds = array<i64: 128, 128>}, {pipeline_mode = #tpu.pipeline_mode<synchronous>, transform_indices = @transform_2, window_bounds = array<i64: 1, 128>}, {pipeline_mode = #tpu.pipeline_mode<synchronous>, transform_indices = @transform_3, window_bounds = array<i64: 128, 128>}, {pipeline_mode = #tpu.pipeline_mode<synchronous>, transform_indices = @transform_4, window_bounds = array<i64: 1, 128>}, {pipeline_mode = #tpu.pipeline_mode<synchronous>, transform_indices = @transform_5, window_bounds = array<i64: 128, 128>}, {pipeline_mode = #tpu.pipeline_mode<synchronous>, transform_indices = @transform_6, window_bounds = array<i64: 1, 128>}, {transform_indices = @transform_7, window_bounds = array<i64: 8, 128>}]} {
    %c0 = arith.constant 0 : index
    %c0_0 = arith.constant 0 : index
    %0 = vector.load %arg1[%c0, %c0_0] : memref<8x128xf32, #tpu.memory_space<vmem>>, vector<8x128xf32>
    %c0_1 = arith.constant 0 : index
    %c0_2 = arith.constant 0 : index
    %1 = vector.load %arg2[%c0_1, %c0_2] : memref<128x128xf32, #tpu.memory_space<vmem>>, vector<128x128xf32>
    %cst = arith.constant dense<0.000000e+00> : vector<8x128xf32>
    %2 = tpu.matmul %0, %1, %cst {dimension_numbers = #tpu.dot_dimension_numbers<[1], [0], [0], [1], [0, 0, 1, 1], [], []>} : vector<8x128xf32>, vector<128x128xf32>, vector<8x128xf32> -> vector<8x128xf32>
    %c0_3 = arith.constant 0 : index
    %c0_4 = arith.constant 0 : index
    %3 = vector.load %arg3[%c0_3, %c0_4] : memref<1x128xf32, #tpu.memory_space<vmem>>, vector<1x128xf32>
    %4 = vector.broadcast %3 : vector<1x128xf32> to vector<8x128xf32>
    %5 = arith.addf %2, %4 : vector<8x128xf32>
    %cst_5 = arith.constant 0.000000e+00 : f32
    %6 = vector.broadcast %cst_5 : f32 to vector<8x128xf32>
    %7 = arith.maximumf %5, %6 : vector<8x128xf32>
    %c0_6 = arith.constant 0 : index
    %c0_7 = arith.constant 0 : index
    %8 = vector.load %arg4[%c0_6, %c0_7] : memref<128x128xf32, #tpu.memory_space<vmem>>, vector<128x128xf32>
    %cst_8 = arith.constant dense<0.000000e+00> : vector<8x128xf32>
    %9 = tpu.matmul %7, %8, %cst_8 {dimension_numbers = #tpu.dot_dimension_numbers<[1], [0], [0], [1], [0, 0, 1, 1], [], []>} : vector<8x128xf32>, vector<128x128xf32>, vector<8x128xf32> -> vector<8x128xf32>
    %c0_9 = arith.constant 0 : index
    %c0_10 = arith.constant 0 : index
    %10 = vector.load %arg5[%c0_9, %c0_10] : memref<1x128xf32, #tpu.memory_space<vmem>>, vector<1x128xf32>
    %11 = vector.broadcast %10 : vector<1x128xf32> to vector<8x128xf32>
    %12 = arith.addf %9, %11 : vector<8x128xf32>
    %cst_11 = arith.constant 0.000000e+00 : f32
    %13 = vector.broadcast %cst_11 : f32 to vector<8x128xf32>
    %14 = arith.maximumf %12, %13 : vector<8x128xf32>
    %c0_12 = arith.constant 0 : index
    %c0_13 = arith.constant 0 : index
    %15 = vector.load %arg6[%c0_12, %c0_13] : memref<128x128xf32, #tpu.memory_space<vmem>>, vector<128x128xf32>
    %cst_14 = arith.constant dense<0.000000e+00> : vector<8x128xf32>
    %16 = tpu.matmul %14, %15, %cst_14 {dimension_numbers = #tpu.dot_dimension_numbers<[1], [0], [0], [1], [0, 0, 1, 1], [], []>} : vector<8x128xf32>, vector<128x128xf32>, vector<8x128xf32> -> vector<8x128xf32>
    %c0_15 = arith.constant 0 : index
    %c0_16 = arith.constant 0 : index
    %17 = vector.load %arg7[%c0_15, %c0_16] : memref<1x128xf32, #tpu.memory_space<vmem>>, vector<1x128xf32>
    %18 = vector.broadcast %17 : vector<1x128xf32> to vector<8x128xf32>
    %19 = arith.addf %16, %18 : vector<8x128xf32>
    %c0_17 = arith.constant 0 : index
    %c0_18 = arith.constant 0 : index
    %20 = vector.load %arg8[%c0_17, %c0_18] : memref<8x128xf32, #tpu.memory_space<vmem>>, vector<8x128xf32>
    tpu.vector_store %arg8[%c0_17, %c0_18], %19 {strides = array<i32>} : memref<8x128xf32, #tpu.memory_space<vmem>>, vector<8x128xf32>,
    return
  }
  func.func @transform_0(%arg0: i32) -> (i32, i32) {
    %c0_i32 = arith.constant 0 : i32
    %c0_i32_0 = arith.constant 0 : i32
    return %arg0, %c0_i32 : i32, i32
  }
  func.func @transform_1(%arg0: i32) -> (i32, i32) {
    %c0_i32 = arith.constant 0 : i32
    %c0_i32_0 = arith.constant 0 : i32
    %c0_i32_1 = arith.constant 0 : i32
    return %c0_i32, %c0_i32_0 : i32, i32
  }
  func.func @transform_2(%arg0: i32) -> (i32, i32) {
    %c0_i32 = arith.constant 0 : i32
    %c0_i32_0 = arith.constant 0 : i32
    %c0_i32_1 = arith.constant 0 : i32
    return %c0_i32, %c0_i32_0 : i32, i32
  }
  func.func @transform_3(%arg0: i32) -> (i32, i32) {
    %c0_i32 = arith.constant 0 : i32
    %c0_i32_0 = arith.constant 0 : i32
    %c0_i32_1 = arith.constant 0 : i32
    return %c0_i32, %c0_i32_0 : i32, i32
  }
  func.func @transform_4(%arg0: i32) -> (i32, i32) {
    %c0_i32 = arith.constant 0 : i32
    %c0_i32_0 = arith.constant 0 : i32
    %c0_i32_1 = arith.constant 0 : i32
    return %c0_i32, %c0_i32_0 : i32, i32
  }
  func.func @transform_5(%arg0: i32) -> (i32, i32) {
    %c0_i32 = arith.constant 0 : i32
    %c0_i32_0 = arith.constant 0 : i32
    %c0_i32_1 = arith.constant 0 : i32
    return %c0_i32, %c0_i32_0 : i32, i32
  }
  func.func @transform_6(%arg0: i32) -> (i32, i32) {
    %c0_i32 = arith.constant 0 : i32
    %c0_i32_0 = arith.constant 0 : i32
    %c0_i32_1 = arith.constant 0 : i32
    return %c0_i32, %c0_i32_0 : i32, i32
  }
  func.func @transform_7(%arg0: i32) -> (i32, i32) {
    %c0_i32 = arith.constant 0 : i32
    %c0_i32_0 = arith.constant 0 : i32
    return %arg0, %c0_i32 : i32, i32
  }
}

module attributes {stable_mosaic.version = 11 : i64} {
  func.func @kernel(%arg0: i32, %arg1: memref<8x128xf32, #tpu.memory_space<vmem>>, %arg2: memref<128x128xf32, #tpu.memory_space<vmem>>, %arg3: memref<1x128xf32, #tpu.memory_space<vmem>>, %arg4: memref<128x128xf32, #tpu.memory_space<vmem>>, %arg5: memref<1x128xf32, #tpu.memory_space<vmem>>, %arg6: memref<128x128xf32, #tpu.memory_space<vmem>>, %arg7: memref<1x128xf32, #tpu.memory_space<vmem>>, %arg8: memref<8x128xf32, #tpu.memory_space<vmem>>) attributes {dimension_semantics = [#tpu.dimension_semantics<parallel>], iteration_bounds = array<i64: 1>, scalar_prefetch = 0 : i64, scratch_operands = 0 : i64, tpu.core_type = #tpu.core_type<tc>, window_params = [{transform_indices = @transform_0, window_bounds = array<i64: 8, 128>}, {pipeline_mode = #tpu.pipeline_mode<synchronous>, transform_indices = @transform_1, window_bounds = array<i64: 128, 128>}, {pipeline_mode = #tpu.pipeline_mode<synchronous>, transform_indices = @transform_2, window_bounds = array<i64: 1, 128>}, {pipeline_mode = #tpu.pipeline_mode<synchronous>, transform_indices = @transform_3, window_bounds = array<i64: 128, 128>}, {pipeline_mode = #tpu.pipeline_mode<synchronous>, transform_indices = @transform_4, window_bounds = array<i64: 1, 128>}, {pipeline_mode = #tpu.pipeline_mode<synchronous>, transform_indices = @transform_5, window_bounds = array<i64: 128, 128>}, {pipeline_mode = #tpu.pipeline_mode<synchronous>, transform_indices = @transform_6, window_bounds = array<i64: 1, 128>}, {transform_indices = @transform_7, window_bounds = array<i64: 8, 128>}]} {
    %c0 = arith.constant 0 : index
    %c0_0 = arith.constant 0 : index
    %0 = vector.load %arg1[%c0, %c0_0] : memref<8x128xf32, #tpu.memory_space<vmem>>, vector<8x128xf32>
    %c0_1 = arith.constant 0 : index
    %c0_2 = arith.constant 0 : index
    %1 = vector.load %arg2[%c0_1, %c0_2] : memref<128x128xf32, #tpu.memory_space<vmem>>, vector<128x128xf32>
    %cst = arith.constant dense<0.000000e+00> : vector<8x128xf32>
    %2 = tpu.matmul %0, %1, %cst {dimension_numbers = #tpu.dot_dimension_numbers<[1], [0], [0], [1], [0, 0, 1, 1], [], []>} : vector<8x128xf32>, vector<128x128xf32>, vector<8x128xf32> -> vector<8x128xf32>
    %c0_3 = arith.constant 0 : index
    %c0_4 = arith.constant 0 : index
    %3 = vector.load %arg3[%c0_3, %c0_4] : memref<1x128xf32, #tpu.memory_space<vmem>>, vector<1x128xf32>
    %4 = vector.broadcast %3 : vector<1x128xf32> to vector<8x128xf32>
    %5 = arith.addf %2, %4 : vector<8x128xf32>
    %cst_5 = arith.constant 0.000000e+00 : f32
    %6 = vector.broadcast %cst_5 : f32 to vector<8x128xf32>
    %7 = arith.maximumf %5, %6 : vector<8x128xf32>
    %c0_6 = arith.constant 0 : index
    %c0_7 = arith.constant 0 : index
    %8 = vector.load %arg4[%c0_6, %c0_7] : memref<128x128xf32, #tpu.memory_space<vmem>>, vector<128x128xf32>
    %cst_8 = arith.constant dense<0.000000e+00> : vector<8x128xf32>
    %9 = tpu.matmul %7, %8, %cst_8 {dimension_numbers = #tpu.dot_dimension_numbers<[1], [0], [0], [1], [0, 0, 1, 1], [], []>} : vector<8x128xf32>, vector<128x128xf32>, vector<8x128xf32> -> vector<8x128xf32>
    %c0_9 = arith.constant 0 : index
    %c0_10 = arith.constant 0 : index
    %10 = vector.load %arg5[%c0_9, %c0_10] : memref<1x128xf32, #tpu.memory_space<vmem>>, vector<1x128xf32>
    %11 = vector.broadcast %10 : vector<1x128xf32> to vector<8x128xf32>
    %12 = arith.addf %9, %11 : vector<8x128xf32>
    %cst_11 = arith.constant 0.000000e+00 : f32
    %13 = vector.broadcast %cst_11 : f32 to vector<8x128xf32>
    %14 = arith.maximumf %12, %13 : vector<8x128xf32>
    %c0_12 = arith.constant 0 : index
    %c0_13 = arith.constant 0 : index
    %15 = vector.load %arg6[%c0_12, %c0_13] : memref<128x128xf32, #tpu.memory_space<vmem>>, vector<128x128xf32>
    %cst_14 = arith.constant dense<0.000000e+00> : vector<8x128xf32>
    %16 = tpu.matmul %14, %15, %cst_14 {dimension_numbers = #tpu.dot_dimension_numbers<[1], [0], [0], [1], [0, 0, 1, 1], [], []>} : vector<8x128xf32>, vector<128x128xf32>, vector<8x128xf32> -> vector<8x128xf32>
    %c0_15 = arith.constant 0 : index
    %c0_16 = arith.constant 0 : index
    %17 = vector.load %arg7[%c0_15, %c0_16] : memref<1x128xf32, #tpu.memory_space<vmem>>, vector<1x128xf32>
    %18 = vector.broadcast %17 : vector<1x128xf32> to vector<8x128xf32>
    %19 = arith.addf %16, %18 : vector<8x128xf32>
    %c0_17 = arith.constant 0 : index
    %c0_18 = arith.constant 0 : index
    %20 = vector.load %arg8[%c0_17, %c0_18] : memref<8x128xf32, #tpu.memory_space<vmem>>, vector<8x128xf32>
    tpu.vector_store %arg8[%c0_17, %c0_18], %19 {strides = array<i32>} : memref<8x128xf32, #tpu.memory_space<vmem>>, vector<8x128xf32>,
    return
  }
  func.func @transform_0(%arg0: i32) -> (i32, i32) {
    %c0_i32 = arith.constant 0 : i32
    %c0_i32_0 = arith.constant 0 : i32
    return %arg0, %c0_i32 : i32, i32
  }
  func.func @transform_1(%arg0: i32) -> (i32, i32) {
    %c0_i32 = arith.constant 0 : i32
    %c0_i32_0 = arith.constant 0 : i32
    %c0_i32_1 = arith.constant 0 : i32
    return %c0_i32, %c0_i32_0 : i32, i32
  }
  func.func @transform_2(%arg0: i32) -> (i32, i32) {
    %c0_i32 = arith.constant 0 : i32
    %c0_i32_0 = arith.constant 0 : i32
    %c0_i32_1 = arith.constant 0 : i32
    return %c0_i32, %c0_i32_0 : i32, i32
  }
  func.func @transform_3(%arg0: i32) -> (i32, i32) {
    %c0_i32 = arith.constant 0 : i32
    %c0_i32_0 = arith.constant 0 : i32
    %c0_i32_1 = arith.constant 0 : i32
    return %c0_i32, %c0_i32_0 : i32, i32
  }
  func.func @transform_4(%arg0: i32) -> (i32, i32) {
    %c0_i32 = arith.constant 0 : i32
    %c0_i32_0 = arith.constant 0 : i32
    %c0_i32_1 = arith.constant 0 : i32
    return %c0_i32, %c0_i32_0 : i32, i32
  }
  func.func @transform_5(%arg0: i32) -> (i32, i32) {
    %c0_i32 = arith.constant 0 : i32
    %c0_i32_0 = arith.constant 0 : i32
    %c0_i32_1 = arith.constant 0 : i32
    return %c0_i32, %c0_i32_0 : i32, i32
  }
  func.func @transform_6(%arg0: i32) -> (i32, i32) {
    %c0_i32 = arith.constant 0 : i32
    %c0_i32_0 = arith.constant 0 : i32
    %c0_i32_1 = arith.constant 0 : i32
    return %c0_i32, %c0_i32_0 : i32, i32
  }
  func.func @transform_7(%arg0: i32) -> (i32, i32) {
    %c0_i32 = arith.constant 0 : i32
    %c0_i32_0 = arith.constant 0 : i32
    return %arg0, %c0_i32 : i32, i32
  }
}

</mosaic_0001>

<bundles_post_ra>
// kernel: tpu_custom_call.1
= control target key start
LH: loop header
LB: loop body
LE: loop exit
PB: predicated region body
PF: predicated region fallthrough
CT: control target
= control target key end

     0   :  { %12 = vsyncpa [#allocation3], 0  ;;  %s440_s0 = inlined_call_operand.hbm [shape: f32[8,128], index: 0, kind: input, shape index: {}]   ;;  %s441_s1 = inlined_call_operand.hbm [shape: f32[128,128], index: 1, kind: input, shape index: {}]   ;;  %s442_s2 = inlined_call_operand.vmem [shape: f32[1,128], index: 2, kind: input, shape index: {}]   ;;  %s443_s3 = inlined_call_operand.hbm [shape: f32[128,128], index: 3, kind: input, shape index: {}]   ;;  %s444_s4 = inlined_call_operand.vmem [shape: f32[1,128], index: 4, kind: input, shape index: {}]   ;;  %s445_s5 = inlined_call_operand.hbm [shape: f32[128,128], index: 5, kind: input, shape index: {}]   ;;  %s446_s6 = inlined_call_operand.vmem [shape: f32[1,128], index: 6, kind: input, shape index: {}]   ;;  %s447_s7 = inlined_call_operand.hbm [shape: f32[8,128], index: 7, kind: output, shape index: {}]  }
   0x1   :  { %13 = vsyncpa [#allocation6], 0 }
   0x2   :  { %14 = vsyncpa [#allocation9], 0  ;;  %s31_s26 = sshll.u32 %s441_s1, 4  ;;  %s32_s26 = int_to_ptr.hbm [resolvable:$true] %s31_s26 }
   0x3   :  { %15 = vsyncpa [#allocation4], 0  ;;  %s369_s27 = smov [#allocation5]   ;;  %s21_s8 = sshll.u32 %s440_s0, 4  ;;  %s22_s8 = int_to_ptr.hbm [resolvable:$true] %s21_s8 }
   0x4   :  { %s33_s28 = sshll.u32 %s369_s27, 4  ;;  %s370_s9 = smov 128   ;;  %s34_s28 = int_to_ptr.vmem [resolvable:$true] %s33_s28 }
   0x5   :  { %s371_s10 = smov 8   ;;  %s372_s11 = smov [#allocation2]  }
   0x6   :  { %39 = dma.hbm_to_vmem [thread:$0]  %s32_s26, 2048, %s34_s28, [#allocation6], %s370_s9, %s370_s9, %s371_s10  }
   0x7   :  { %s23_s12 = sshll.u32 %s372_s11, 4  ;;  %s46_s15 = sshll.u32 %s443_s3, 4  ;;  %s24_s12 = int_to_ptr.vmem [resolvable:$true] %s23_s12  ;;  %s47_s15 = int_to_ptr.hbm [resolvable:$true] %s46_s15 }
   0x8   :  { %26 = dma.hbm_to_vmem [thread:$0]  %s22_s8, 128, %s24_s12, [#allocation3]  }
   0x9   :  { %s61_s17 = sshll.u32 %s445_s5, 4  ;;  %s373_s18 = smov [#allocation7]   ;;  %s62_s17 = int_to_ptr.hbm [resolvable:$true] %s61_s17 }
   0xa   :  { %s48_s19 = sshll.u32 %s373_s18, 4  ;;  %s374_s0 = smov [#allocation8]   ;;  %s49_s19 = int_to_ptr.vmem [resolvable:$true] %s48_s19 }
   0xb   :  { %54 = dma.hbm_to_vmem [thread:$0]  %s47_s15, 2048, %s49_s19, [#allocation6], %s370_s9, %s370_s9, %s371_s10  }
   0xc   :  { %s63_s20 = sshll.u32 %s374_s0, 4  ;;  %s64_s20 = int_to_ptr.vmem [resolvable:$true] %s63_s20 }
   0xd   :  { %69 = dma.hbm_to_vmem [thread:$0]  %s62_s17, 2048, %s64_s20, [#allocation9], %s370_s9, %s370_s9, %s371_s10  }
   0xe   :  { %361 = dma.done.wait [#allocation3], 128  }
   0xf   :  { %362 = vsyncadd [#allocation3], 4294967168 }
  0x10   :  { %363 = dma.done.wait [#allocation6], 4096  }
  0x11   :  { %364 = vsyncadd [#allocation6], 4294963200 }
  0x12   :  { %365 = dma.done.wait [#allocation9], 2048  }
  0x13   :  { %366 = vsyncadd [#allocation9], 4294965248  ;;  %v104_v0 = vld [vmem:[#allocation5 + $0x78] sm:$0xff]  ;;  %v103_v1 = vld [vmem:[#allocation5 + $0x70] sm:$0xff]  ;;  %s375_s24 = smov [#allocation10]   ;;  %s219_s28 = sshll.u32 %s447_s7, 4  ;;  %s220_s28 = int_to_ptr.hbm [resolvable:$true] %s219_s28 }
  0x14   :  { %109 = vmatpush.msra.mxu0 %v104_v0  ;;  %v102_v2 = vld [vmem:[#allocation5 + $0x68] sm:$0xff]  ;;  %v101_v3 = vld [vmem:[#allocation5 + $0x60] sm:$0xff]  ;;  %v145_v4 = vld [vmem:[#allocation7 + $0x78] sm:$0xff]  ;;  %s217_s25 = sshll.u32 %s375_s24, 4  ;;  %s218_s25 = int_to_ptr.vmem [resolvable:$true] %s217_s25 }
  0x15   :  { %v100_v5 = vld [vmem:[#allocation5 + $0x58] sm:$0xff]  ;;  %150 = vmatpush.msra.mxu1 %v145_v4  ;;  %v144_v6 = vld [vmem:[#allocation7 + $0x70] sm:$0xff]  ;;  %v143_v7 = vld [vmem:[#allocation7 + $0x68] sm:$0xff] }
  0x16   :  { %110 = vmatpush.msra.mxu0 %v103_v1  ;;  %v99_v8 = vld [vmem:[#allocation5 + $0x50] sm:$0xff]  ;;  %v142_v9 = vld [vmem:[#allocation7 + $0x60] sm:$0xff]  ;;  %v98_v10 = vld [vmem:[#allocation5 + $0x48] sm:$0xff] }
  0x17   :  { %151 = vmatpush.msra.mxu1 %v144_v6  ;;  %v141_v11 = vld [vmem:[#allocation7 + $0x58] sm:$0xff]  ;;  %v97_v12 = vld [vmem:[#allocation5 + $0x40] sm:$0xff]  ;;  %v140_v13 = vld [vmem:[#allocation7 + $0x50] sm:$0xff] }
  0x18   :  { %111 = vmatpush.msra.mxu0 %v102_v2  ;;  %v96_v14 = vld [vmem:[#allocation5 + $0x38] sm:$0xff]  ;;  %v139_v15 = vld [vmem:[#allocation7 + $0x48] sm:$0xff]  ;;  %v95_v16 = vld [vmem:[#allocation5 + $0x30] sm:$0xff] }
  0x19   :  { %152 = vmatpush.msra.mxu1 %v143_v7  ;;  %v138_v17 = vld [vmem:[#allocation7 + $0x40] sm:$0xff]  ;;  %v94_v18 = vld [vmem:[#allocation5 + $0x28] sm:$0xff]  ;;  %v137_v19 = vld [vmem:[#allocation7 + $0x38] sm:$0xff] }
  0x1a   :  { %112 = vmatpush.msra.mxu0 %v101_v3  ;;  %v93_v20 = vld [vmem:[#allocation5 + $0x20] sm:$0xff]  ;;  %v136_v21 = vld [vmem:[#allocation7 + $0x30] sm:$0xff]  ;;  %v92_v22 = vld [vmem:[#allocation5 + $0x18] sm:$0xff] }
  0x1b   :  { %153 = vmatpush.msra.mxu1 %v142_v9  ;;  %v135_v23 = vld [vmem:[#allocation7 + $0x28] sm:$0xff]  ;;  %v91_v24 = vld [vmem:[#allocation5 + $0x10] sm:$0xff]  ;;  %v134_v25 = vld [vmem:[#allocation7 + $0x20] sm:$0xff] }
  0x1c   :  { %113 = vmatpush.msra.mxu0 %v100_v5  ;;  %v90_v26 = vld [vmem:[#allocation5 + $0x8] sm:$0xff]  ;;  %v133_v27 = vld [vmem:[#allocation7 + $0x18] sm:$0xff]  ;;  %v89_v28 = vld [vmem:[#allocation5] sm:$0xff] }
  0x1d   :  { %154 = vmatpush.msra.mxu1 %v141_v11  ;;  %v88_v29 = vld [vmem:[#allocation2] sm:$0xff]  ;;  %v132_v30 = vld [vmem:[#allocation7 + $0x10] sm:$0xff]  ;;  %v131_v31 = vld [vmem:[#allocation7 + $0x8] sm:$0xff] }
  0x1e   :  { %114 = vmatpush.msra.mxu0 %v99_v8  ;;  %v130_v32 = vld [vmem:[#allocation7] sm:$0xff]  ;;  %v186_v33 = vld [vmem:[#allocation8 + $0x78] sm:$0xff]  ;;  %v185_v34 = vld [vmem:[#allocation8 + $0x70] sm:$0xff] }
  0x1f   :  { %155 = vmatpush.msra.mxu1 %v140_v13  ;;  %191 = vmatpush.msra.mxu2 %v186_v33  ;;  %v184_v35 = vld [vmem:[#allocation8 + $0x68] sm:$0xff]  ;;  %v183_v36 = vld [vmem:[#allocation8 + $0x60] sm:$0xff]  ;;  %v182_v37 = vld [vmem:[#allocation8 + $0x58] sm:$0xff] }
  0x20   :  { %115 = vmatpush.msra.mxu0 %v98_v10  ;;  %v181_v38 = vld [vmem:[#allocation8 + $0x50] sm:$0xff]  ;;  %v180_v39 = vld [vmem:[#allocation8 + $0x48] sm:$0xff]  ;;  %v179_v40 = vld [vmem:[#allocation8 + $0x40] sm:$0xff] }
  0x21   :  { %156 = vmatpush.msra.mxu1 %v139_v15  ;;  %192 = vmatpush.msra.mxu2 %v185_v34  ;;  %v178_v41 = vld [vmem:[#allocation8 + $0x38] sm:$0xff]  ;;  %v177_v42 = vld [vmem:[#allocation8 + $0x30] sm:$0xff]  ;;  %v176_v43 = vld [vmem:[#allocation8 + $0x28] sm:$0xff] }
  0x22   :  { %116 = vmatpush.msra.mxu0 %v97_v12  ;;  %v175_v44 = vld [vmem:[#allocation8 + $0x20] sm:$0xff]  ;;  %v174_v45 = vld [vmem:[#allocation8 + $0x18] sm:$0xff]  ;;  %v173_v50 = vld [vmem:[#allocation8 + $0x10] sm:$0xff] }
  0x23   :  { %157 = vmatpush.msra.mxu1 %v138_v17  ;;  %193 = vmatpush.msra.mxu2 %v184_v35  ;;  %v238_v46 = vld [vmem:[%s442_s2] ss:$0 sm:$0xff]  ;;  %v172_v51 = vld [vmem:[#allocation8 + $0x8] sm:$0xff]  ;;  %v171_v52 = vld [vmem:[#allocation8] sm:$0xff] }
  0x24   :  { %117 = vmatpush.msra.mxu0 %v96_v14  ;;  %v239_v53 = vld [vmem:[%s444_s4] ss:$0 sm:$0xff] }
  0x25   :  { %158 = vmatpush.msra.mxu1 %v137_v19  ;;  %194 = vmatpush.msra.mxu2 %v183_v36  ;;  %v240_v57 = vld [vmem:[%s446_s6] ss:$0 sm:$0xff] }
  0x26   :  { %118 = vmatpush.msra.mxu0 %v95_v16 }
  0x27   :  { %159 = vmatpush.msra.mxu1 %v136_v21  ;;  %195 = vmatpush.msra.mxu2 %v182_v37 }
  0x28   :  { %119 = vmatpush.msra.mxu0 %v94_v18 }
  0x29   :  { %160 = vmatpush.msra.mxu1 %v135_v23  ;;  %196 = vmatpush.msra.mxu2 %v181_v38 }
  0x2a   :  { %120 = vmatpush.msra.mxu0 %v93_v20 }
  0x2b   :  { %161 = vmatpush.msra.mxu1 %v134_v25  ;;  %197 = vmatpush.msra.mxu2 %v180_v39 }
  0x2c   :  { %121 = vmatpush.msra.mxu0 %v92_v22 }
  0x2d   :  { %162 = vmatpush.msra.mxu1 %v133_v27  ;;  %198 = vmatpush.msra.mxu2 %v179_v40 }
  0x2e   :  { %122 = vmatpush.msra.mxu0 %v91_v24 }
  0x2f   :  { %163 = vmatpush.msra.mxu1 %v132_v30  ;;  %199 = vmatpush.msra.mxu2 %v178_v41 }
  0x30   :  { %123 = vmatpush.msra.mxu0 %v90_v26 }
  0x31   :  { %164 = vmatpush.msra.mxu1 %v131_v31  ;;  %200 = vmatpush.msra.mxu2 %v177_v42 }
  0x32   :  { %124 = vmatpush.msra.mxu0 %v89_v28 }
  0x33   :  { %125 = vmatmul.f32.vlgmr.msra.gmra.mxu0 %v88_v29  ;;  %165 = vmatpush.msra.mxu1 %v130_v32 }
  0x34   :  { %201 = vmatpush.msra.mxu2 %v176_v43 }
  0x36   :  { %202 = vmatpush.msra.mxu2 %v175_v44 }
  0x38   :  { %203 = vmatpush.msra.mxu2 %v174_v45 }
  0x3a   :  { %204 = vmatpush.msra.mxu2 %v173_v50 }
  0x3c   :  { %205 = vmatpush.msra.mxu2 %v172_v51 }
  0x3e   :  { %206 = vmatpush.msra.mxu2 %v171_v52 }
  0xb0   :  { %v126_v47 = vpop.f32.mrf.mxu0 }
  0xb1   :  { %v127_v48 = vadd.f32 %v238_v46, %v126_v47 }
  0xb3   :  { %v129_v49 = vmax.f32 %v127_v48, 0.0 }
  0xb5   :  { %166 = vmatmul.f32.vlgmr.msra.gmra.mxu1 %v129_v49 }
 0x132   :  { %v167_v54 = vpop.f32.mrf.mxu1 }
 0x133   :  { %v168_v55 = vadd.f32 %v239_v53, %v167_v54 }
 0x135   :  { %v170_v56 = vmax.f32 %v168_v55, 0.0 }
 0x137   :  { %207 = vmatmul.f32.vlgmr.msra.gmra.mxu2 %v170_v56 }
 0x1ba   :  { %v208_v58 = vpop.f32.mrf.mxu2 }
 0x1bb   :  { %v209_v59 = vadd.f32 %v240_v57, %v208_v58 }
 0x1bd   :  { %211 = vst [vmem:[#allocation10] sm:$0xff] %v209_v59 }
 0x1be   :  { %222 = dma.vmem_to_hbm [thread:$0]  %s218_s25, 128, %s220_s28, [#allocation4]  }
 0x1bf   :  { %367 = dma.done.wait [#allocation4], 128  }
 0x1c0   :  { %368 = vsyncadd [#allocation4], 4294967168 }
 0x1c1   :  { %227 = vsyncpa [#allocation3], 1 }
 0x1c2   :  { %228 = vsyncpa [#allocation6], 1 }
 0x1c3   :  { %229 = vsyncpa [#allocation9], 1 }
 0x1c4   :  { %230 = vsyncpa [#allocation4], 1 }

// kernel: tpu_custom_call.1
= control target key start
LH: loop header
LB: loop body
LE: loop exit
PB: predicated region body
PF: predicated region fallthrough
CT: control target
= control target key end

     0   :  { %12 = vsyncpa [#allocation3], 0  ;;  %s440_s0 = inlined_call_operand.hbm [shape: f32[8,128], index: 0, kind: input, shape index: {}]   ;;  %s441_s1 = inlined_call_operand.hbm [shape: f32[128,128], index: 1, kind: input, shape index: {}]   ;;  %s442_s2 = inlined_call_operand.vmem [shape: f32[1,128], index: 2, kind: input, shape index: {}]   ;;  %s443_s3 = inlined_call_operand.hbm [shape: f32[128,128], index: 3, kind: input, shape index: {}]   ;;  %s444_s4 = inlined_call_operand.vmem [shape: f32[1,128], index: 4, kind: input, shape index: {}]   ;;  %s445_s5 = inlined_call_operand.hbm [shape: f32[128,128], index: 5, kind: input, shape index: {}]   ;;  %s446_s6 = inlined_call_operand.vmem [shape: f32[1,128], index: 6, kind: input, shape index: {}]   ;;  %s447_s7 = inlined_call_operand.hbm [shape: f32[8,128], index: 7, kind: output, shape index: {}]  }
   0x1   :  { %13 = vsyncpa [#allocation6], 0 }
   0x2   :  { %14 = vsyncpa [#allocation9], 0  ;;  %s31_s26 = sshll.u32 %s441_s1, 4  ;;  %s32_s26 = int_to_ptr.hbm [resolvable:$true] %s31_s26 }
   0x3   :  { %15 = vsyncpa [#allocation4], 0  ;;  %s369_s27 = smov [#allocation5]   ;;  %s21_s8 = sshll.u32 %s440_s0, 4  ;;  %s22_s8 = int_to_ptr.hbm [resolvable:$true] %s21_s8 }
   0x4   :  { %s33_s28 = sshll.u32 %s369_s27, 4  ;;  %s370_s9 = smov 128   ;;  %s34_s28 = int_to_ptr.vmem [resolvable:$true] %s33_s28 }
   0x5   :  { %s371_s10 = smov 8   ;;  %s372_s11 = smov [#allocation2]  }
   0x6   :  { %39 = dma.hbm_to_vmem [thread:$0]  %s32_s26, 2048, %s34_s28, [#allocation6], %s370_s9, %s370_s9, %s371_s10  }
   0x7   :  { %s23_s12 = sshll.u32 %s372_s11, 4  ;;  %s46_s15 = sshll.u32 %s443_s3, 4  ;;  %s24_s12 = int_to_ptr.vmem [resolvable:$true] %s23_s12  ;;  %s47_s15 = int_to_ptr.hbm [resolvable:$true] %s46_s15 }
   0x8   :  { %26 = dma.hbm_to_vmem [thread:$0]  %s22_s8, 128, %s24_s12, [#allocation3]  }
   0x9   :  { %s61_s17 = sshll.u32 %s445_s5, 4  ;;  %s373_s18 = smov [#allocation7]   ;;  %s62_s17 = int_to_ptr.hbm [resolvable:$true] %s61_s17 }
   0xa   :  { %s48_s19 = sshll.u32 %s373_s18, 4  ;;  %s374_s0 = smov [#allocation8]   ;;  %s49_s19 = int_to_ptr.vmem [resolvable:$true] %s48_s19 }
   0xb   :  { %54 = dma.hbm_to_vmem [thread:$0]  %s47_s15, 2048, %s49_s19, [#allocation6], %s370_s9, %s370_s9, %s371_s10  }
   0xc   :  { %s63_s20 = sshll.u32 %s374_s0, 4  ;;  %s64_s20 = int_to_ptr.vmem [resolvable:$true] %s63_s20 }
   0xd   :  { %69 = dma.hbm_to_vmem [thread:$0]  %s62_s17, 2048, %s64_s20, [#allocation9], %s370_s9, %s370_s9, %s371_s10  }
   0xe   :  { %361 = dma.done.wait [#allocation3], 128  }
   0xf   :  { %362 = vsyncadd [#allocation3], 4294967168 }
  0x10   :  { %363 = dma.done.wait [#allocation6], 4096  }
  0x11   :  { %364 = vsyncadd [#allocation6], 4294963200 }
  0x12   :  { %365 = dma.done.wait [#allocation9], 2048  }
  0x13   :  { %366 = vsyncadd [#allocation9], 4294965248  ;;  %v104_v0 = vld [vmem:[#allocation5 + $0x78] sm:$0xff]  ;;  %v103_v1 = vld [vmem:[#allocation5 + $0x70] sm:$0xff]  ;;  %s375_s24 = smov [#allocation10]   ;;  %s219_s28 = sshll.u32 %s447_s7, 4  ;;  %s220_s28 = int_to_ptr.hbm [resolvable:$true] %s219_s28 }
  0x14   :  { %109 = vmatpush.msra.mxu0 %v104_v0  ;;  %v102_v2 = vld [vmem:[#allocation5 + $0x68] sm:$0xff]  ;;  %v101_v3 = vld [vmem:[#allocation5 + $0x60] sm:$0xff]  ;;  %v145_v4 = vld [vmem:[#allocation7 + $0x78] sm:$0xff]  ;;  %s217_s25 = sshll.u32 %s375_s24, 4  ;;  %s218_s25 = int_to_ptr.vmem [resolvable:$true] %s217_s25 }
  0x15   :  { %v100_v5 = vld [vmem:[#allocation5 + $0x58] sm:$0xff]  ;;  %150 = vmatpush.msra.mxu1 %v145_v4  ;;  %v144_v6 = vld [vmem:[#allocation7 + $0x70] sm:$0xff]  ;;  %v143_v7 = vld [vmem:[#allocation7 + $0x68] sm:$0xff] }
  0x16   :  { %110 = vmatpush.msra.mxu0 %v103_v1  ;;  %v99_v8 = vld [vmem:[#allocation5 + $0x50] sm:$0xff]  ;;  %v142_v9 = vld [vmem:[#allocation7 + $0x60] sm:$0xff]  ;;  %v98_v10 = vld [vmem:[#allocation5 + $0x48] sm:$0xff] }
  0x17   :  { %151 = vmatpush.msra.mxu1 %v144_v6  ;;  %v141_v11 = vld [vmem:[#allocation7 + $0x58] sm:$0xff]  ;;  %v97_v12 = vld [vmem:[#allocation5 + $0x40] sm:$0xff]  ;;  %v140_v13 = vld [vmem:[#allocation7 + $0x50] sm:$0xff] }
  0x18   :  { %111 = vmatpush.msra.mxu0 %v102_v2  ;;  %v96_v14 = vld [vmem:[#allocation5 + $0x38] sm:$0xff]  ;;  %v139_v15 = vld [vmem:[#allocation7 + $0x48] sm:$0xff]  ;;  %v95_v16 = vld [vmem:[#allocation5 + $0x30] sm:$0xff] }
  0x19   :  { %152 = vmatpush.msra.mxu1 %v143_v7  ;;  %v138_v17 = vld [vmem:[#allocation7 + $0x40] sm:$0xff]  ;;  %v94_v18 = vld [vmem:[#allocation5 + $0x28] sm:$0xff]  ;;  %v137_v19 = vld [vmem:[#allocation7 + $0x38] sm:$0xff] }
  0x1a   :  { %112 = vmatpush.msra.mxu0 %v101_v3  ;;  %v93_v20 = vld [vmem:[#allocation5 + $0x20] sm:$0xff]  ;;  %v136_v21 = vld [vmem:[#allocation7 + $0x30] sm:$0xff]  ;;  %v92_v22 = vld [vmem:[#allocation5 + $0x18] sm:$0xff] }
  0x1b   :  { %153 = vmatpush.msra.mxu1 %v142_v9  ;;  %v135_v23 = vld [vmem:[#allocation7 + $0x28] sm:$0xff]  ;;  %v91_v24 = vld [vmem:[#allocation5 + $0x10] sm:$0xff]  ;;  %v134_v25 = vld [vmem:[#allocation7 + $0x20] sm:$0xff] }
  0x1c   :  { %113 = vmatpush.msra.mxu0 %v100_v5  ;;  %v90_v26 = vld [vmem:[#allocation5 + $0x8] sm:$0xff]  ;;  %v133_v27 = vld [vmem:[#allocation7 + $0x18] sm:$0xff]  ;;  %v89_v28 = vld [vmem:[#allocation5] sm:$0xff] }
  0x1d   :  { %154 = vmatpush.msra.mxu1 %v141_v11  ;;  %v88_v29 = vld [vmem:[#allocation2] sm:$0xff]  ;;  %v132_v30 = vld [vmem:[#allocation7 + $0x10] sm:$0xff]  ;;  %v131_v31 = vld [vmem:[#allocation7 + $0x8] sm:$0xff] }
  0x1e   :  { %114 = vmatpush.msra.mxu0 %v99_v8  ;;  %v130_v32 = vld [vmem:[#allocation7] sm:$0xff]  ;;  %v186_v33 = vld [vmem:[#allocation8 + $0x78] sm:$0xff]  ;;  %v185_v34 = vld [vmem:[#allocation8 + $0x70] sm:$0xff] }
  0x1f   :  { %155 = vmatpush.msra.mxu1 %v140_v13  ;;  %191 = vmatpush.msra.mxu2 %v186_v33  ;;  %v184_v35 = vld [vmem:[#allocation8 + $0x68] sm:$0xff]  ;;  %v183_v36 = vld [vmem:[#allocation8 + $0x60] sm:$0xff]  ;;  %v182_v37 = vld [vmem:[#allocation8 + $0x58] sm:$0xff] }
  0x20   :  { %115 = vmatpush.msra.mxu0 %v98_v10  ;;  %v181_v38 = vld [vmem:[#allocation8 + $0x50] sm:$0xff]  ;;  %v180_v39 = vld [vmem:[#allocation8 + $0x48] sm:$0xff]  ;;  %v179_v40 = vld [vmem:[#allocation8 + $0x40] sm:$0xff] }
  0x21   :  { %156 = vmatpush.msra.mxu1 %v139_v15  ;;  %192 = vmatpush.msra.mxu2 %v185_v34  ;;  %v178_v41 = vld [vmem:[#allocation8 + $0x38] sm:$0xff]  ;;  %v177_v42 = vld [vmem:[#allocation8 + $0x30] sm:$0xff]  ;;  %v176_v43 = vld [vmem:[#allocation8 + $0x28] sm:$0xff] }
  0x22   :  { %116 = vmatpush.msra.mxu0 %v97_v12  ;;  %v175_v44 = vld [vmem:[#allocation8 + $0x20] sm:$0xff]  ;;  %v174_v45 = vld [vmem:[#allocation8 + $0x18] sm:$0xff]  ;;  %v173_v50 = vld [vmem:[#allocation8 + $0x10] sm:$0xff] }
  0x23   :  { %157 = vmatpush.msra.mxu1 %v138_v17  ;;  %193 = vmatpush.msra.mxu2 %v184_v35  ;;  %v238_v46 = vld [vmem:[%s442_s2] ss:$0 sm:$0xff]  ;;  %v172_v51 = vld [vmem:[#allocation8 + $0x8] sm:$0xff]  ;;  %v171_v52 = vld [vmem:[#allocation8] sm:$0xff] }
  0x24   :  { %117 = vmatpush.msra.mxu0 %v96_v14  ;;  %v239_v53 = vld [vmem:[%s444_s4] ss:$0 sm:$0xff] }
  0x25   :  { %158 = vmatpush.msra.mxu1 %v137_v19  ;;  %194 = vmatpush.msra.mxu2 %v183_v36  ;;  %v240_v57 = vld [vmem:[%s446_s6] ss:$0 sm:$0xff] }
  0x26   :  { %118 = vmatpush.msra.mxu0 %v95_v16 }
  0x27   :  { %159 = vmatpush.msra.mxu1 %v136_v21  ;;  %195 = vmatpush.msra.mxu2 %v182_v37 }
  0x28   :  { %119 = vmatpush.msra.mxu0 %v94_v18 }
  0x29   :  { %160 = vmatpush.msra.mxu1 %v135_v23  ;;  %196 = vmatpush.msra.mxu2 %v181_v38 }
  0x2a   :  { %120 = vmatpush.msra.mxu0 %v93_v20 }
  0x2b   :  { %161 = vmatpush.msra.mxu1 %v134_v25  ;;  %197 = vmatpush.msra.mxu2 %v180_v39 }
  0x2c   :  { %121 = vmatpush.msra.mxu0 %v92_v22 }
  0x2d   :  { %162 = vmatpush.msra.mxu1 %v133_v27  ;;  %198 = vmatpush.msra.mxu2 %v179_v40 }
  0x2e   :  { %122 = vmatpush.msra.mxu0 %v91_v24 }
  0x2f   :  { %163 = vmatpush.msra.mxu1 %v132_v30  ;;  %199 = vmatpush.msra.mxu2 %v178_v41 }
  0x30   :  { %123 = vmatpush.msra.mxu0 %v90_v26 }
  0x31   :  { %164 = vmatpush.msra.mxu1 %v131_v31  ;;  %200 = vmatpush.msra.mxu2 %v177_v42 }
  0x32   :  { %124 = vmatpush.msra.mxu0 %v89_v28 }
  0x33   :  { %125 = vmatmul.f32.vlgmr.msra.gmra.mxu0 %v88_v29  ;;  %165 = vmatpush.msra.mxu1 %v130_v32 }
  0x34   :  { %201 = vmatpush.msra.mxu2 %v176_v43 }
  0x36   :  { %202 = vmatpush.msra.mxu2 %v175_v44 }
  0x38   :  { %203 = vmatpush.msra.mxu2 %v174_v45 }
  0x3a   :  { %204 = vmatpush.msra.mxu2 %v173_v50 }
  0x3c   :  { %205 = vmatpush.msra.mxu2 %v172_v51 }
  0x3e   :  { %206 = vmatpush.msra.mxu2 %v171_v52 }
  0xb0   :  { %v126_v47 = vpop.f32.mrf.mxu0 }
  0xb1   :  { %v127_v48 = vadd.f32 %v238_v46, %v126_v47 }
  0xb3   :  { %v129_v49 = vmax.f32 %v127_v48, 0.0 }
  0xb5   :  { %166 = vmatmul.f32.vlgmr.msra.gmra.mxu1 %v129_v49 }
 0x132   :  { %v167_v54 = vpop.f32.mrf.mxu1 }
 0x133   :  { %v168_v55 = vadd.f32 %v239_v53, %v167_v54 }
 0x135   :  { %v170_v56 = vmax.f32 %v168_v55, 0.0 }
 0x137   :  { %207 = vmatmul.f32.vlgmr.msra.gmra.mxu2 %v170_v56 }
 0x1ba   :  { %v208_v58 = vpop.f32.mrf.mxu2 }
 0x1bb   :  { %v209_v59 = vadd.f32 %v240_v57, %v208_v58 }
 0x1bd   :  { %211 = vst [vmem:[#allocation10] sm:$0xff] %v209_v59 }
 0x1be   :  { %222 = dma.vmem_to_hbm [thread:$0]  %s218_s25, 128, %s220_s28, [#allocation4]  }
 0x1bf   :  { %367 = dma.done.wait [#allocation4], 128  }
 0x1c0   :  { %368 = vsyncadd [#allocation4], 4294967168 }
 0x1c1   :  { %227 = vsyncpa [#allocation3], 1 }
 0x1c2   :  { %228 = vsyncpa [#allocation6], 1 }
 0x1c3   :  { %229 = vsyncpa [#allocation9], 1 }
 0x1c4   :  { %230 = vsyncpa [#allocation4], 1 }

</bundles_post_ra>
